<compile_context>
chip_gen: v5e
topology: v5e:2x2
jax: 0.10.0
libtpu: 0.0.40
codegen_flags: <defaults>
</compile_context>

<pallas_src>
import jax
import jax.numpy as jnp
from jax.experimental import pallas as pl
from jax.experimental.pallas import tpu as pltpu


def _compress_ch(in_channels, reduction):
    compression = in_channels // reduction
    if compression < 2:
        compression = 2
    return compression


def scse_kernel(x_ref, sw_ref, bs_ref, o_ref):
    # x_ref block: (1, C, TL) for the current (L-tile, batch) grid point.
    x = x_ref[0]                            # (C, TL), native dtype (f32 or bf16)
    sw = sw_ref[0]                          # (C, 2) f32: col 0 = s (cSE gate), col 1 = ws ∘ s
    s = sw[:, 0:1]                          # (C, 1)
    wss = sw[:, 1:2]                        # (C, 1)
    bs = bs_ref[0]                          # scalar sSE bias (SMEM)

    # sSE gate: sigmoid((ws ∘ sᵀ) @ x + bs) — VPU broadcast-multiply + sublane (XLU) reduce
    # in f32 (type promotion handles bf16 x), avoiding a 1-row MXU matvec.
    gate = jax.nn.sigmoid(jnp.sum(wss * x, axis=0, keepdims=True) + bs)   # (1, TL) f32

    # Elementwise tail stays in the input dtype (bf16 VPU path on v6e/v7x; no-op for f32).
    cse = x * s.astype(x.dtype)             # broadcast over L -> (C, TL)
    sse = x * gate.astype(x.dtype)          # broadcast over C -> (C, TL)
    o_ref[0] = jnp.maximum(cse, sse).astype(o_ref.dtype)


def _choose_tile_l(C, L, itemsize, target_bytes):
    """Lane-dense (multiple-of-128) L-tile with block <= ~target_bytes; full L if it fits."""
    lanes = max(1, target_bytes // (C * 128 * itemsize))
    tl = int(lanes) * 128
    if tl >= L:
        return L            # single full-extent block along L (always legal, <= target_bytes)
    return tl               # partial trailing block handled via pl.cdiv grid


def scse_1d(x, w1, b1, w2, b2, ws, bs, *, target_block_bytes=8 * 1024 * 1024):
    """x: (N, C, L); 1x1-conv weights flattened to 2-D matrices (as in the PyTorch module)."""
    N, C, L = x.shape

    # ---- cSE squeeze path hoisted to plain XLA (only N*C scalars of work) ----
    # dtype=f32 on the mean fuses the convert into the reduction (no full f32 copy of x).
    pooled = jnp.mean(x, axis=-1, keepdims=True, dtype=jnp.float32)             # (N, C, 1)
    w1f = w1.astype(jnp.float32)
    w2f = w2.astype(jnp.float32)
    h = jnp.einsum('oc,ncl->nol', w1f, pooled) + b1.astype(jnp.float32)[None]   # (N, comp, 1)
    h = jnp.maximum(h, 0.0)
    s = jax.nn.sigmoid(jnp.einsum('co,nol->ncl', w2f, h)
                       + b2.astype(jnp.float32)[None])                          # (N, C, 1)

    # Fold the per-channel cSE gate into the sSE weight: ws @ (s * x) == (ws ∘ sᵀ) @ x.
    ws_s = ws[0].astype(jnp.float32)[None, :, None] * s                         # (N, C, 1)
    sw = jnp.concatenate([s, ws_s], axis=-1)                                    # (N, C, 2) f32
    bs_sc = bs.reshape(1).astype(jnp.float32)                                   # (1,) -> SMEM

    itemsize = jnp.dtype(x.dtype).itemsize
    tile_l = _choose_tile_l(C, L, itemsize, target_block_bytes)
    grid = (pl.cdiv(L, tile_l), N)      # L-tiles first so megacore can shard the long axis

    cost = pl.CostEstimate(
        flops=5 * N * C * L,            # mul+reduce for gate, 2 gated muls, max
        transcendentals=N * L,          # sigmoid per output position
        bytes_accessed=2 * N * C * L * itemsize + N * C * 2 * 4,
    )

    return pl.pallas_call(
        scse_kernel,
        out_shape=jax.ShapeDtypeStruct((N, C, L), x.dtype),
        grid=grid,
        in_specs=[
            pl.BlockSpec((1, C, tile_l), lambda l, n: (n, 0, l)),   # x tile
            pl.BlockSpec((1, C, 2), lambda l, n: (n, 0, 0)),        # packed [s, ws∘s]
            pl.BlockSpec(memory_space=pltpu.MemorySpace.SMEM),      # bs scalar in SMEM
        ],
        out_specs=pl.BlockSpec((1, C, tile_l), lambda l, n: (n, 0, l)),
        compiler_params=pltpu.CompilerParams(
            dimension_semantics=("parallel", "parallel"),
            vmem_limit_bytes=40 << 20,   # 4x 8 MiB blocks (in+out double-buffered) + slack
        ),
        cost_estimate=cost,
    )(x, sw, bs_sc)


def scse_1d_ref(x, w1, b1, w2, b2, ws, bs):
    """Pure-JAX reference of the PyTorch forward (for verification)."""
    pooled = jnp.mean(x, axis=-1, keepdims=True)                     # (N, C, 1)
    h = jnp.einsum('oc,ncl->nol', w1, pooled) + b1[None, :, :]       # (N, comp, 1)
    h = jnp.maximum(h, 0.0)
    s = jax.nn.sigmoid(jnp.einsum('co,nol->ncl', w2, h) + b2[None, :, :])   # (N, C, 1)
    cse = x * s
    gate = jax.nn.sigmoid(jnp.einsum('oc,ncl->nol', ws, cse) + bs[None, :, :])  # (N, 1, L)
    sse = x * gate
    return jnp.maximum(cse, sse)


if __name__ == "__main__":
    # Small, TPU-friendly shapes consistent with SCSEModule1d(in_channels=16, reduction=16)
    N, C, L = 2, 16, 512
    reduction = 16
    comp = _compress_ch(C, reduction)  # -> 2

    key = jax.random.PRNGKey(0)
    kx, k1, kb1, k2, kb2, ks, kbs = jax.random.split(key, 7)

    x = jax.random.normal(kx, (N, C, L), dtype=jnp.float32)

    # Deterministic synthetic parameters (Conv1d kernel_size=1 weights flattened to matrices).
    w1 = 0.2 * jax.random.normal(k1, (comp, C), dtype=jnp.float32)   # cSE conv1: C -> comp
    b1 = 0.1 * jax.random.normal(kb1, (comp, 1), dtype=jnp.float32)
    w2 = 0.2 * jax.random.normal(k2, (C, comp), dtype=jnp.float32)   # cSE conv2: comp -> C
    b2 = 0.1 * jax.random.normal(kb2, (C, 1), dtype=jnp.float32)
    ws = 0.2 * jax.random.normal(ks, (1, C), dtype=jnp.float32)      # sSE conv: C -> 1
    bs = 0.1 * jax.random.normal(kbs, (1, 1), dtype=jnp.float32)

    out = scse_1d(x, w1, b1, w2, b2, ws, bs)
    out = jax.block_until_ready(out)

    ref = scse_1d_ref(x, w1, b1, w2, b2, ws, bs)
    assert out.shape == (N, C, L)
    assert jnp.allclose(out, ref, rtol=1e-5, atol=1e-5), "Pallas output mismatch vs reference"

    print("KERNEL_OK")
</pallas_src>

<mosaic_0001>
module attributes {stable_mosaic.version = 11 : i64} {
  func.func @scse_kernel(%arg0: i32, %arg1: i32, %arg2: memref<1x16x512xf32, #tpu.memory_space<vmem>>, %arg3: memref<1x16x2xf32, #tpu.memory_space<vmem>>, %arg4: memref<1xf32, #tpu.memory_space<smem>>, %arg5: memref<1x16x512xf32, #tpu.memory_space<vmem>>) attributes {dimension_semantics = [#tpu.dimension_semantics<parallel>, #tpu.dimension_semantics<parallel>], iteration_bounds = array<i64: 1, 2>, scalar_prefetch = 0 : i64, scratch_operands = 0 : i64, tpu.core_type = #tpu.core_type<tc>, window_params = [{transform_indices = @transform_0, window_bounds = array<i64: 1, 16, 512>}, {transform_indices = @transform_1, window_bounds = array<i64: 1, 16, 2>}, {transform_indices = @transform_2, window_bounds = array<i64: 1>}, {transform_indices = @transform_3, window_bounds = array<i64: 1, 16, 512>}]} {
    %c0 = arith.constant 0 : index
    %c0_0 = arith.constant 0 : index
    %c0_1 = arith.constant 0 : index
    %0 = vector.load %arg2[%c0, %c0_0, %c0_1] : memref<1x16x512xf32, #tpu.memory_space<vmem>>, vector<1x16x512xf32>
    %1 = vector.shape_cast %0 : vector<1x16x512xf32> to vector<16x512xf32>
    %c0_2 = arith.constant 0 : index
    %c0_3 = arith.constant 0 : index
    %c0_4 = arith.constant 0 : index
    %2 = vector.load %arg3[%c0_2, %c0_3, %c0_4] : memref<1x16x2xf32, #tpu.memory_space<vmem>>, vector<1x16x2xf32>
    %3 = vector.shape_cast %2 : vector<1x16x2xf32> to vector<16x2xf32>
    %4 = vector.extract_strided_slice %3 {offsets = [0, 0], sizes = [16, 1], strides = [1, 1]} : vector<16x2xf32> to vector<16x1xf32>
    %5 = vector.extract_strided_slice %3 {offsets = [0, 1], sizes = [16, 1], strides = [1, 1]} : vector<16x2xf32> to vector<16x1xf32>
    %c0_5 = arith.constant 0 : index
    %6 = memref.load %arg4[%c0_5] : memref<1xf32, #tpu.memory_space<smem>>
    %7 = vector.broadcast %5 : vector<16x1xf32> to vector<16x512xf32>
    %8 = arith.mulf %7, %1 : vector<16x512xf32>
    %cst = arith.constant dense<0.000000e+00> : vector<512xf32>
    %9 = vector.multi_reduction <add>, %8, %cst [0] : vector<16x512xf32> to vector<512xf32>
    %10 = vector.shape_cast %9 : vector<512xf32> to vector<1x512xf32>
    %11 = vector.broadcast %6 : f32 to vector<1x512xf32>
    %12 = arith.addf %10, %11 : vector<1x512xf32>
    %13 = arith.negf %12 : vector<1x512xf32>
    %14 = math.exp %13 : vector<1x512xf32>
    %cst_6 = arith.constant 1.000000e+00 : f32
    %15 = vector.broadcast %cst_6 : f32 to vector<1x512xf32>
    %16 = arith.addf %15, %14 : vector<1x512xf32>
    %17 = arith.divf %15, %16 : vector<1x512xf32>
    %18 = vector.broadcast %4 : vector<16x1xf32> to vector<16x512xf32>
    %19 = arith.mulf %1, %18 : vector<16x512xf32>
    %20 = vector.broadcast %17 : vector<1x512xf32> to vector<16x512xf32>
    %21 = arith.mulf %1, %20 : vector<16x512xf32>
    %22 = arith.maximumf %19, %21 : vector<16x512xf32>
    %c0_7 = arith.constant 0 : index
    %c0_8 = arith.constant 0 : index
    %c0_9 = arith.constant 0 : index
    %23 = vector.load %arg5[%c0_7, %c0_8, %c0_9] : memref<1x16x512xf32, #tpu.memory_space<vmem>>, vector<1x16x512xf32>
    %24 = vector.shape_cast %23 : vector<1x16x512xf32> to vector<16x512xf32>
    %25 = vector.shape_cast %22 : vector<16x512xf32> to vector<1x16x512xf32>
    tpu.vector_store %arg5[%c0_7, %c0_8, %c0_9], %25 {strides = array<i32>} : memref<1x16x512xf32, #tpu.memory_space<vmem>>, vector<1x16x512xf32>,
    return
  }
  func.func @transform_0(%arg0: i32, %arg1: i32) -> (i32, i32, i32) {
    %c0_i32 = arith.constant 0 : i32
    %c0_i32_0 = arith.constant 0 : i32
    return %arg1, %c0_i32, %arg0 : i32, i32, i32
  }
  func.func @transform_1(%arg0: i32, %arg1: i32) -> (i32, i32, i32) {
    %c0_i32 = arith.constant 0 : i32
    %c0_i32_0 = arith.constant 0 : i32
    %c0_i32_1 = arith.constant 0 : i32
    return %arg1, %c0_i32, %c0_i32_0 : i32, i32, i32
  }
  func.func @transform_2(%arg0: i32, %arg1: i32) -> i32 {
    %c0_i32 = arith.constant 0 : i32
    %c0_i32_0 = arith.constant 0 : i32
    return %c0_i32 : i32
  }
  func.func @transform_3(%arg0: i32, %arg1: i32) -> (i32, i32, i32) {
    %c0_i32 = arith.constant 0 : i32
    %c0_i32_0 = arith.constant 0 : i32
    return %arg1, %c0_i32, %arg0 : i32, i32, i32
  }
}

</mosaic_0001>

<bundles_post_ra>
// kernel: tpu_custom_call.1
= control target key start
LH: loop header
LB: loop body
LE: loop exit
PB: predicated region body
PF: predicated region fallthrough
CT: control target
= control target key end

     0   :  { %s1007_s0 = inlined_call_operand.hbm [shape: f32[2,16,512], index: 0, kind: input, shape index: {}]   ;;  %s1008_s1 = inlined_call_operand.vmem [shape: f32[2,16,2], index: 1, kind: input, shape index: {}]   ;;  %s1009_s2 = inlined_call_operand.<no memory space> [shape: f32[1], index: 2, kind: input, shape index: {}]   ;;  %s1010_s3 = inlined_call_operand.hbm [shape: f32[2,16,512], index: 3, kind: output, shape index: {}]  }
   0x1   :  { %8 = sst [smem:[#allocation2]] %s1009_s2 }
   0x2   :  { %9 = vsyncpa [#allocation4], 0 }
   0x3   :  { %11 = vsyncpa [#allocation4 + $0x1], 0 }
   0x4   :  { %12 = vsyncpa [#allocation5], 0 }
   0x5   :  { %14 = vsyncpa [#allocation5 + $0x1], 0  ;;  %s781_s14 = smov 0   ;;  %s783_s15 = smov 0  }
   0x6   :  { %s785_s16 = smov 0   ;;  %s787_s17 = smov 0  }
   0x7   :  { %s789_s18 = smov 0   ;;  %s791_s19 = smov 0  }
   0x8 LB: > { %s527_s2 = sadd.s32 4294967295, %s750_s19   ;;  %s528_s20 = sadd.s32 4294967294, %s750_s19   ;;  %s750_s19 = sphi %s791_s19, %s20_s19   ;;  %s746_s18 = sphi %s789_s18, %s1027_s18   ;;  %s742_s17 = sphi %s787_s17, %s1026_s17   ;;  %s738_s16 = sphi %s785_s16, %s1025_s16   ;;  %s734_s15 = sphi %s783_s15, %s1024_s15   ;;  %s730_s14 = sphi %s781_s14, %s1023_s14  }
   0x9   : > { %s29_s21 = sadd.s32 1, %s746_s18  ;;  %s41_s22 = sadd.s32 1, %s738_s16 }
   0xa   : > { %p30_p0 = scmp.ge.s32.totalorder %s29_s21, 2  ;;  %p48_p1 = scmp.ne.s32.totalorder %s738_s16, %s734_s15 }
   0xb   : > { %p49_p2 = scmp.eq.s32.totalorder %s750_s19, 0  ;;  %p54_p3 = scmp.ne.s32.totalorder %s734_s15, %s730_s14 }
   0xc   : > { %s1029_s21 = smov (%p30_p0, %s29_s21), 0  ;;  %p55_p5 = scmp.eq.s32.totalorder %s527_s2, 0 }
   0xd   : > { %p822_p4 = por %p49_p2, %p48_p1  ;;  %s36_s24 = ssub.s32 %s746_s18, %s1029_s21 }
   0xe   : > { %p127_p6 = scmp.eq.s32.totalorder %s527_s2, 1  ;;  %p39_p7 = scmp.eq.s32.totalorder %s36_s24, 0 }
   0xf   : > { %p828_p8 = por %p55_p5, %p54_p3  ;;  %p133_p10 = scmp.eq.s32.totalorder %s528_s20, 1 }
  0x10   : > { %p832_p9 = por %p127_p6, %p48_p1  ;;  %p530_p12 = scmp.ge.s32.totalorder %s750_s19, 2 }
  0x11   : > { %s837_s27 = scalar_select %p39_p7, %s738_s16, %s41_s22  }
  0x12   : > { %p839_p11 = por %p133_p10, %p54_p3  ;;  %p563_p13 = scmp.lt.s32.totalorder %s750_s19, 2 }
  0x13   : > { %s156_s29 = sand.u32 1, %s738_s16   ;;  %s548_s4 = sshll.u32 %s746_s18, 6 }
  0x14   : > { %s531_s30 = sshll.u32 %s156_s29, 6  ;;  %s167_s7 = scalar_lea.hbm %s1007_s0, %s548_s4 }
  0x15   : > { %s160_s8 = scalar_lea.vmem [#allocation3], %s531_s30  ;;  %s168_s10 = sshll.u32 %s167_s7, 4  ;;  %s169_s10 = int_to_ptr.hbm [resolvable:$true] %s168_s10 }
  0x16   : > { %s170_s9 = sshll.u32 %s160_s8, 4  ;;  %p556_p0 = pnand %p563_p13, %p822_p4  ;;  %s171_s9 = int_to_ptr.vmem [resolvable:$true] %s170_s9 }
  0x17   : > { %p534_p1 = scmp.ge.s32.totalorder %s750_s19, 1  ;;  %s157_s11 = scalar_lea.sflag [#allocation4], %s156_s29 }
  0x18   : > { %s752_s12 = smov 512   ;;  %s753_s13 = smov 32  }
  0x19   : > { %558 = dma.hbm_to_vmem [thread:$0]  (!%p556_p0), %s169_s10, 1024, %s171_s9, %s157_s11, %s752_s12, %s752_s12, %s753_s13  }
  0x1a   : > { %p186_p2 = scmp.lt.s32.totalorder %s750_s19, 3 }
  0x1c   : > { %p187_p3 = pnand %p534_p1, %p186_p2 }
  0x1d   : > { %s855_s2 = sand.u32 (!%p187_p3), 1, %s734_s15  }
  0x1e   : > { %190 = sbr.rel (%p187_p3) target bundleno = 227 (0xe3), region = 32  ;;  %s535_s20 = sshll.u32 (!%p187_p3), %s855_s2, 6 }
  0x1f   : > { %s193_s22 = scalar_lea.sflag (!%p187_p3), [#allocation4], %s855_s2  ;;  %s196_s23 = scalar_lea.vmem (!%p187_p3), [#allocation3], %s535_s20 }
  0x23   : > { %721 = dma.done.wait (%p828_p8), %s193_s22, 1024  }
  0x24   : > { %723 = vsyncadd (%p828_p8), %s193_s22, 4294966272  ;;  %p226_p4 = scmp.lt.s32.totalorder %s742_s17, 1  ;;  %v754_v0 = vmov 1   ;;  %v755_v1 = vmov 0   ;;  %v870_v5 = vld [vmem:[%s196_s23] sm:$0xff]  ;;  %v872_v6 = vld [vmem:[%s196_s23 + $0x8] sm:$0xff] }
  0x25   : > { %619 = vset.pattern.permute.xlu0 %v754_v0  ;;  %620 = vset.pattern.permute.xlu1 %v755_v1  ;;  %v874_v7 = vld [vmem:[%s196_s23 + $0x10] sm:$0xff]  ;;  %v876_v8 = vld [vmem:[%s196_s23 + $0x18] sm:$0xff]  ;;  %v878_v9 = vld [vmem:[%s196_s23 + $0x20] sm:$0xff]  ;;  %s242_s25 = sld [smem:[#allocation2]]  ;;  %s550_s6 = sshll.u32 %s742_s17, 6 }
  0x26   : > { %s227_s24 = scalar_select %p226_p4, %s742_s17, 1  ;;  %v880_v10 = vld [vmem:[%s196_s23 + $0x28] sm:$0xff]  ;;  %v882_v11 = vld [vmem:[%s196_s23 + $0x30] sm:$0xff]  ;;  %v884_v12 = vld [vmem:[%s196_s23 + $0x38] sm:$0xff] }
  0x27   : > { %s424_s8 = scalar_lea.hbm %s1010_s3, %s550_s6  ;;  %s224_s9 = scalar_lea.vmem [#allocation6], %s535_s20 }
  0x28   : > { %s549_s29 = sshll.u32 %s227_s24, 4  ;;  %s425_s10 = sshll.u32 %s224_s9, 4  ;;  %s426_s10 = int_to_ptr.vmem [resolvable:$true] %s425_s10 }
  0x29   : > { %s230_s5 = scalar_lea.vmem %s1008_s1, %s549_s29  ;;  %s427_s11 = sshll.u32 %s424_s8, 4  ;;  %s428_s11 = int_to_ptr.hbm [resolvable:$true] %s427_s11 }
  0x2a   : > { %v240_v2 = vld [vmem:[%s230_s5] sm:$0xff]  ;;  %v241_v3 = vld [vmem:[%s230_s5 + $0x8] sm:$0xff]  ;;  %s411_s12 = scalar_lea.sflag [#allocation5], %s855_s2  ;;  %s682_s13 = sshra.s32 %s428_s11, 4  ;;  %s683_s13 = int_to_ptr.hbm [resolvable:$true] %s682_s13 }
  0x2b   : > { %245 = vperm.xlu0 %619, %v240_v2   ;;  %371 = vperm.xlu1 %620, %v240_v2   ;;  %v289_v46 = vstv %s242_s25  ;;  %s684_s20 = scalar_lea.hbm %s683_s13, 64  ;;  %s688_s24 = scalar_lea.hbm %s1010_s3, 128 }
  0x2c   : > { %p685_p5 = scmp.ne.s32.totalorder %s683_s13, %s684_s20  ;;  %p689_p8 = scmp.lt.s32.totalorder %s683_s13, %s1010_s3 }
  0x2d   : > { %p690_p10 = scmp.lt.s32.totalorder %s688_s24, %s684_s20 }
  0x2e   : > { %p686_p6 = pnand %p685_p5, %p832_p9 }
  0x2f   : > { %p691_p13 = por %p690_p10, %p689_p8 }
  0x30   : > { %p687_p7 = pneg %p686_p6 }
  0x32   : > { %p692_p0 = pnand %p691_p13, %p687_p7 }
  0x33   : > { %250 = vperm.xlu0 %619, %v241_v3   ;;  %375 = vperm.xlu1 %620, %v241_v3  }
  0x3b   : > { %621 = vset.pattern.permute.xlu0 %v755_v1 }
  0x9d   : > { %v246_v4 = vpop.permute.xlu0 %245  ;;  %v372_v59 = vpop.permute.xlu1 %371 }
  0x9e   : > { %v253_v13 = vmul.f32 %v246_v4, %v870_v5  ;;  %v254_v14 = vmul.f32 %v246_v4, %v872_v6  ;;  %v255_v15 = vmul.f32 %v246_v4, %v874_v7  ;;  %v256_v16 = vmul.f32 %v246_v4, %v876_v8 }
  0xa5   : > { %v251_v17 = vpop.permute.xlu0 %250 }
  0xa6   : > { %v257_v18 = vmul.f32 %v251_v17, %v878_v9  ;;  %v258_v19 = vmul.f32 %v251_v17, %v880_v10  ;;  %v259_v20 = vmul.f32 %v251_v17, %v882_v11  ;;  %v260_v21 = vmul.f32 %v251_v17, %v884_v12 }
  0xa8   : > { %v261_v22 = vadd.f32 %v257_v18, %v253_v13  ;;  %v268_v23 = vadd.f32 %v258_v19, %v254_v14  ;;  %v275_v24 = vadd.f32 %v259_v20, %v255_v15  ;;  %v282_v25 = vadd.f32 %v260_v21, %v256_v16  ;;  %v897_v14 = vpop.permute.xlu1 %375 }
  0xa9   : > { %v900_v16 = vmul.f32 %v372_v59, %v870_v5  ;;  %v903_v19 = vmul.f32 %v372_v59, %v872_v6  ;;  %v906_v20 = vmul.f32 %v372_v59, %v874_v7  ;;  %v909_v21 = vmul.f32 %v372_v59, %v876_v8 }
  0xaa   : > { %v262_v26 = vrot.slane %v261_v22, 4  ;;  %v269_v27 = vrot.slane %v268_v23, 4  ;;  %v276_v28 = vrot.slane %v275_v24, 4  ;;  %v283_v29 = vrot.slane %v282_v25, 4 }
  0xac   : > { %v263_v30 = vadd.f32 %v262_v26, %v261_v22  ;;  %v270_v31 = vadd.f32 %v269_v27, %v268_v23  ;;  %v277_v32 = vadd.f32 %v276_v28, %v275_v24  ;;  %v284_v33 = vadd.f32 %v283_v29, %v282_v25 }
  0xad   : > { %v913_v24 = vmul.f32 %v897_v14, %v878_v9 }
  0xae   : > { %v264_v34 = vrot.slane %v263_v30, 2  ;;  %v271_v35 = vrot.slane %v270_v31, 2  ;;  %v278_v36 = vrot.slane %v277_v32, 2  ;;  %v285_v37 = vrot.slane %v284_v33, 2 }
  0xb0   : > { %v265_v38 = vadd.f32 %v264_v34, %v263_v30  ;;  %v272_v39 = vadd.f32 %v271_v35, %v270_v31  ;;  %v279_v40 = vadd.f32 %v278_v36, %v277_v32  ;;  %v286_v41 = vadd.f32 %v285_v37, %v284_v33 }
  0xb2   : > { %v266_v42 = vrot.slane %v265_v38, 1  ;;  %v273_v43 = vrot.slane %v272_v39, 1  ;;  %v280_v44 = vrot.slane %v279_v40, 1  ;;  %v287_v45 = vrot.slane %v286_v41, 1 }
  0xb4   : > { %v267_v47 = vadd.f32 %v266_v42, %v265_v38  ;;  %v274_v48 = vadd.f32 %v273_v43, %v272_v39  ;;  %v281_v49 = vadd.f32 %v280_v44, %v279_v40  ;;  %v288_v50 = vadd.f32 %v287_v45, %v286_v41 }
  0xb6   : > { %v290_v51 = vadd.f32 %v289_v46, %v267_v47  ;;  %v291_v52 = vadd.f32 %v289_v46, %v274_v48  ;;  %v292_v53 = vadd.f32 %v289_v46, %v281_v49  ;;  %v293_v54 = vadd.f32 %v289_v46, %v288_v50 }
  0xb8   : > { %v539_v55 = vmul.f32 -1.442695, %v290_v51  ;;  %v540_v56 = vmul.f32 -1.442695, %v291_v52  ;;  %v541_v57 = vmul.f32 -1.442695, %v292_v53 }
  0xb9   : > { %v542_v58 = vmul.f32 -1.442695, %v293_v54 }
  0xba   : > { %622 = vpow2.f32 %v539_v55 }
  0xbb   : > { %624 = vpow2.f32 %v540_v56 }
  0xbc   : > { %626 = vpow2.f32 %v541_v57 }
  0xbd   : > { %628 = vpow2.f32 %v542_v58 }
  0xc0   : > { %v623_v60 = vpop.eup %622 }
  0xc1   : > { %v625_v61 = vpop.eup %624  ;;  %v306_v62 = vadd.f32 1.0, %v623_v60 }
  0xc2   : > { %v627_v63 = vpop.eup %626  ;;  %v307_v0 = vadd.f32 1.0, %v625_v61 }
  0xc3   : > { %v629_v1 = vpop.eup %628  ;;  %v308_v2 = vadd.f32 1.0, %v627_v63  ;;  %630 = vrcp.f32 %v306_v62  ;;  %v319_v4 = vand.u32 2147483647, %v306_v62  ;;  %v321_v13 = vand.u32 2147483648, %v306_v62 }
  0xc4   : > { %v894_v3 = vadd.f32 1.0, %v629_v1  ;;  %632 = vrcp.f32 %v307_v0  ;;  %v334_v15 = vand.u32 2147483647, %v307_v0  ;;  %v336_v18 = vand.u32 2147483648, %v307_v0 }
  0xc5   : > { %634 = vrcp.f32 %v308_v2  ;;  %vm315_vm0 = vweird.f32 %v306_v62  ;;  %vm330_vm1 = vweird.f32 %v307_v0  ;;  %vm915_vm2 = vcmp.eq.f32.partialorder %v319_v4, 8.507059e+37 }
  0xc6   : > { %636 = vrcp.f32 %v894_v3  ;;  %v322_v27 = vor.u32 1.1754944e-38, %v321_v13  ;;  %vm345_vm3 = vweird.f32 %v308_v2  ;;  %vm919_vm4 = vcmp.eq.f32.partialorder %v334_v15, 8.507059e+37 }
  0xc7   : > { %v349_v33 = vand.u32 2147483647, %v308_v2  ;;  %v337_v35 = vor.u32 1.1754944e-38, %v336_v18  ;;  %v351_v36 = vand.u32 2147483648, %v308_v2  ;;  %v364_v40 = vand.u32 2147483647, %v894_v3 }
  0xc8   : > { %v366_v43 = vand.u32 2147483648, %v894_v3  ;;  %vm360_vm8 = vweird.f32 %v894_v3 }
  0xc9   : > { %v631_v17 = vpop.eup %630  ;;  %vm928_vm10 = vcmp.eq.f32.partialorder %v349_v33, 8.507059e+37  ;;  %v352_v51 = vor.u32 1.1754944e-38, %v351_v36  ;;  %vm933_vm13 = vcmp.eq.f32.partialorder %v364_v40, 8.507059e+37 }
  0xca   : > { %v633_v22 = vpop.eup %632  ;;  %v311_v23 = vmul.f32 %v631_v17, %v306_v62  ;;  %vm316_vm5 = vweird.f32 %v631_v17  ;;  %v367_v56 = vor.u32 1.1754944e-38, %v366_v43 }
  0xcb   : > { %v635_v25 = vpop.eup %634  ;;  %v326_v28 = vmul.f32 %v633_v22, %v307_v0  ;;  %vm331_vm6 = vweird.f32 %v633_v22  ;;  %vm317_vm9 = vmor %vm315_vm0, %vm316_vm5 }
  0xcc   : > { %v637_v29 = vpop.eup %636  ;;  %v312_v30 = vsub.f32 1.0, %v311_v23  ;;  %v341_v32 = vmul.f32 %v635_v25, %v308_v2  ;;  %vm346_vm7 = vweird.f32 %v635_v25  ;;  %vm332_vm12 = vmor %vm330_vm1, %vm331_vm6 }
  0xcd   : > { %v327_v34 = vsub.f32 1.0, %v326_v28  ;;  %v356_v37 = vmul.f32 %v637_v29, %v894_v3  ;;  %vm361_vm11 = vweird.f32 %v637_v29  ;;  %vm347_vm14 = vmor %vm345_vm3, %vm346_vm7 }
  0xce   : > { %v313_v38 = vmul.f32 %v631_v17, %v312_v30  ;;  %v342_v39 = vsub.f32 1.0, %v341_v32  ;;  %vm362_vm15 = vmor %vm360_vm8, %vm361_vm11 }
  0xcf   : > { %v328_v41 = vmul.f32 %v633_v22, %v327_v34  ;;  %v357_v42 = vsub.f32 1.0, %v356_v37 }
  0xd0   : > { %v314_v44 = vadd.f32 %v631_v17, %v313_v38  ;;  %v343_v45 = vmul.f32 %v635_v25, %v342_v39 }
  0xd1   : > { %v329_v46 = vadd.f32 %v633_v22, %v328_v41  ;;  %v358_v48 = vmul.f32 %v637_v29, %v357_v42 }
  0xd2   : > { %v318_v49 = vsel %vm317_vm9, %v631_v17, %v314_v44  ;;  %v344_v50 = vadd.f32 %v635_v25, %v343_v45 }
  0xd3   : > { %v323_v53 = vsel %vm915_vm2, %v322_v27, %v318_v49  ;;  %v333_v54 = vsel %vm332_vm12, %v633_v22, %v329_v46  ;;  %v359_v55 = vadd.f32 %v637_v29, %v358_v48 }
  0xd4   : > { %v338_v57 = vsel %vm919_vm4, %v337_v35, %v333_v54  ;;  %v348_v58 = vsel %vm347_vm14, %v635_v25, %v344_v50  ;;  %v386_v59 = vmul.f32 %v323_v53, %v870_v5  ;;  %v390_v60 = vmul.f32 %v323_v53, %v878_v9 }
  0xd5   : > { %v353_v61 = vsel %vm928_vm10, %v352_v51, %v348_v58  ;;  %v363_v62 = vsel %vm362_vm15, %v637_v29, %v359_v55  ;;  %v387_v63 = vmul.f32 %v338_v57, %v872_v6  ;;  %v391_v0 = vmul.f32 %v338_v57, %v880_v10 }
  0xd6   : > { %v368_v1 = vsel %vm933_vm13, %v367_v56, %v363_v62  ;;  %v388_v2 = vmul.f32 %v353_v61, %v874_v7  ;;  %v394_v3 = vmax.f32 %v900_v16, %v386_v59  ;;  %v392_v5 = vmul.f32 %v353_v61, %v882_v11 }
  0xd7   : > { %v389_v9 = vmul.f32 %v368_v1, %v876_v8  ;;  %v395_v4 = vmax.f32 %v903_v19, %v387_v63  ;;  %v383_v6 = vmul.f32 %v897_v14, %v880_v10  ;;  %v393_v13 = vmul.f32 %v368_v1, %v884_v12 }
  0xd8   : > { %v396_v15 = vmax.f32 %v906_v20, %v388_v2  ;;  %402 = vst [vmem:[%s224_s9] sm:$0xff] %v394_v3  ;;  %v384_v7 = vmul.f32 %v897_v14, %v882_v11  ;;  %v398_v16 = vmax.f32 %v913_v24, %v390_v60  ;;  %v385_v8 = vmul.f32 %v897_v14, %v884_v12 }
  0xd9   : > { %v397_v17 = vmax.f32 %v909_v21, %v389_v9  ;;  %403 = vst [vmem:[%s224_s9 + $0x8] sm:$0xff] %v395_v4  ;;  %v399_v10 = vmax.f32 %v383_v6, %v391_v0 }
  0xda   : > { %404 = vst [vmem:[%s224_s9 + $0x10] sm:$0xff] %v396_v15  ;;  %v400_v18 = vmax.f32 %v384_v7, %v392_v5  ;;  %v401_v19 = vmax.f32 %v385_v8, %v393_v13 }
  0xdb   : > { %405 = vst [vmem:[%s224_s9 + $0x18] sm:$0xff] %v397_v17 }
  0xdc   : > { %406 = vst [vmem:[%s224_s9 + $0x20] sm:$0xff] %v398_v16 }
  0xdd   : > { %407 = vst [vmem:[%s224_s9 + $0x28] sm:$0xff] %v399_v10 }
  0xde   : > { %408 = vst [vmem:[%s224_s9 + $0x30] sm:$0xff] %v400_v18 }
  0xdf   : > { %409 = vst [vmem:[%s224_s9 + $0x38] sm:$0xff] %v401_v19 }
  0xe0   : > { %695 = shalt.err (!%p692_p0)
}
  0xe1   : > { %s756_s2 = smov 512   ;;  %s757_s4 = smov 32  }
  0xe2   : > { %553 = dma.vmem_to_hbm [thread:$0]  (%p832_p9), %s426_s10, 1024, %s428_s11, %s411_s12, %s756_s2, %s756_s2, %s757_s4  }
  0xe3 PF: > { %s442_s5 = sand.u32 1, %s730_s14   ;;  %p560_p1 = pnand %p530_p12, %p839_p11 }
  0xe4   : > { %s443_s25 = scalar_lea.sflag [#allocation5], %s442_s5 }
  0xe5   : > { %p561_p2 = pneg %p560_p1 }
  0xe7   : > { %725 = dma.done.wait (%p561_p2), %s443_s25, 1024  }
  0xe8   : > { %727 = vsyncadd (%p561_p2), %s443_s25, 4294966272  ;;  %s20_s19 = sadd.s32 1, %s750_s19   ;;  %s1023_s14 = smov %s734_s15 }
  0xe9   : > { %p17_p3 = scmp.ge.s32.totalorder %s20_s19, 4   ;;  %s1024_s15 = smov %s738_s16 }
  0xea   : > { %s1025_s16 = smov %s837_s27  ;;  %s1026_s17 = smov %s746_s18 }
  0xeb   : > { %s1027_s18 = smov %s1029_s21  ;;  %19 = sbr.rel (!%p17_p3) target bundleno = 8 (0x8), region = 80 }
  0xf0   :  { %449 = vsyncpa [#allocation4], 1 }
  0xf1   :  { %451 = vsyncpa [#allocation4 + $0x1], 1 }
  0xf2   :  { %452 = vsyncpa [#allocation5], 1 }
  0xf3   :  { %454 = vsyncpa [#allocation5 + $0x1], 1 }

</bundles_post_ra>
